<compile_context>
chip_gen: v6e
topology: v6e:2x2x1
jax: 0.10.0
libtpu: 0.0.40
codegen_flags: <defaults>
</compile_context>

<pallas_src>
import functools

import jax
import jax.numpy as jnp
import numpy as np
from jax import lax
from jax.experimental import pallas as pl
from jax.experimental.pallas import tpu as pltpu


# ---------------------------------------------------------------------------
# Kernels: inputs are one or two (3, TB) tiles, output is (F, TB); TB on lanes
# ---------------------------------------------------------------------------

def _copy_kernel(*refs):
    # encoding_type == 'none': identity on the stacked state.
    out_ref = refs[-1]
    for k, r in enumerate(refs[:-1]):
        out_ref[3 * k:3 * k + 3, :] = r[...]


def _unit_norm_kernel(*refs, eps):
    # per vector: out rows [ |x|, x/|x| (3 rows) ]
    out_ref = refs[-1]
    for k, r in enumerate(refs[:-1]):
        x = r[0:1, :]                              # (1, TB) full-lane vregs
        y = r[1:2, :]
        z = r[2:3, :]
        sq = x * x + y * y + z * z                 # VPU only (no XLU reduce)
        norm = jnp.sqrt(sq)                        # torch.norm
        # F.normalize: x / max(|x|, eps) == x * rsqrt(max(|x|^2, eps^2))  (EUP)
        inv = lax.rsqrt(jnp.maximum(sq, eps * eps))
        bo = 4 * k
        out_ref[bo + 0:bo + 1, :] = norm
        out_ref[bo + 1:bo + 2, :] = x * inv
        out_ref[bo + 2:bo + 3, :] = y * inv
        out_ref[bo + 3:bo + 4, :] = z * inv


def _nerf_kernel(*refs, L, anchor_every):
    # Octave l rows: [sin(2^l*pi*state) (d rows), cos(2^l*pi*state) (d rows)],
    # where state = concat of the input pieces along sublanes.
    out_ref = refs[-1]
    ins = refs[:-1]
    d = 3 * len(ins)
    for k, r in enumerate(ins):
        x = r[...]                                 # (3, TB)
        s = c = None
        for l in range(L):
            if l % anchor_every == 0:
                ang = x * np.float32((2.0 ** l) * np.pi)
                s = jnp.sin(ang)                   # exact anchor (EUP)
                c = jnp.cos(ang)
            else:
                # angle doubling on the VPU instead of 2 more EUP calls/octave
                s, c = 2.0 * s * c, 1.0 - 2.0 * s * s
            r0 = 2 * d * l
            out_ref[r0 + 3 * k:r0 + 3 * k + 3, :] = s
            out_ref[r0 + d + 3 * k:r0 + d + 3 * k + 3, :] = c


# ---------------------------------------------------------------------------
# Wrapper mirroring the PyTorch StateEncoder forward pass
# ---------------------------------------------------------------------------

class StateEncoderPallas:
    _EPS = 1e-12                 # torch.nn.functional.normalize default eps
    _LANE = 128
    _MAX_TILE = 4096             # lanes (batch rows) per block, upper cap
    _VMEM_BUDGET = 8 * 1024 * 1024   # bytes for double-buffered in+out blocks
    _ANCHOR_EVERY = 4            # exact sin/cos every 4 octaves, doubling between

    def __init__(self, encoding_type, encoding_type_parameters, disable_velocity):
        self.disable_velocity = disable_velocity
        num_vectors = 1 if disable_velocity else 2
        self.state_dim = 3 * num_vectors

        if encoding_type == "none":
            self.output_size = 3 * num_vectors
            self._kernel = _copy_kernel
        elif encoding_type == "unit_vector_norm_separate":
            self.output_size = 4 * num_vectors
            self._kernel = functools.partial(_unit_norm_kernel, eps=self._EPS)
        elif encoding_type == "nerf_positional":
            L = encoding_type_parameters[encoding_type]["L"]
            self.output_size = 2 * self.state_dim * L
            self._kernel = functools.partial(
                _nerf_kernel, L=L, anchor_every=self._ANCHOR_EVERY)
        elif encoding_type == "ray_encoding_learned":
            # TODO(synk): requires external shared RayEncoder; not implementable here.
            raise NotImplementedError("ray_encoding_learned needs a shared RayEncoder")
        else:
            raise ValueError(f"Unknown encoding type in state encoder {encoding_type}")

    def get_output_size(self):
        return self.output_size

    def _tile_lanes(self, batch):
        # Largest 128-multiple tile whose double-buffered in+out blocks fit the budget.
        bytes_per_lane = 4 * (self.state_dim + self.output_size) * 2
        tb = self._VMEM_BUDGET // bytes_per_lane
        tb = (tb // self._LANE) * self._LANE
        tb = max(self._LANE, min(self._MAX_TILE, tb))
        b_rounded = ((batch + self._LANE - 1) // self._LANE) * self._LANE
        return min(tb, b_rounded)

    def __call__(self, rel_pos, vel):
        B, D = rel_pos.shape
        assert D == 3

        pieces = [rel_pos] if self.disable_velocity else [rel_pos, vel]
        F = self.output_size

        tb = self._tile_lanes(B)
        padded_b = ((B + tb - 1) // tb) * tb

        # Pad batch (zero pad is safe for every encoding) and transpose to (3, PB).
        inputs_t = []
        for a in pieces:
            a = a.astype(jnp.float32)
            if padded_b != B:
                a = jnp.pad(a, ((0, padded_b - B), (0, 0)))
            inputs_t.append(a.T)                              # (3, padded_b)

        in_specs = [pl.BlockSpec((3, tb), lambda i: (0, i)) for _ in inputs_t]

        out_t = pl.pallas_call(
            self._kernel,
            out_shape=jax.ShapeDtypeStruct((F, padded_b), jnp.float32),
            grid_spec=pltpu.PrefetchScalarGridSpec(
                num_scalar_prefetch=0,
                grid=(padded_b // tb,),
                in_specs=in_specs,
                out_specs=pl.BlockSpec((F, tb), lambda i: (0, i)),
            ),
            compiler_params=pltpu.CompilerParams(
                dimension_semantics=("parallel",),       # batch shards across TCs (v7x)
                vmem_limit_bytes=32 * 1024 * 1024,       # safe on v5e/v6e/v7x
            ),
        )(*inputs_t)

        return out_t[:, :B].T                                 # back to (B, F)


# ---------------------------------------------------------------------------
# Pure-JAX references (for correctness check)
# ---------------------------------------------------------------------------

def _ref_none(p, v, disable_velocity=False):
    return p if disable_velocity else jnp.concatenate([p, v], axis=-1)


def _ref_unit_norm(p, v, disable_velocity=False, eps=1e-12):
    def enc(x):
        n = jnp.linalg.norm(x, axis=-1, keepdims=True)
        return jnp.concatenate([n, x / jnp.maximum(n, eps)], axis=-1)
    return enc(p) if disable_velocity else jnp.concatenate([enc(p), enc(v)], axis=-1)


def _ref_nerf(p, v, L, disable_velocity=False):
    state = p if disable_velocity else jnp.concatenate([p, v], axis=-1)
    feats = []
    for l in range(L):
        freq = (2.0 ** l) * np.pi
        feats.append(jnp.sin(freq * state))
        feats.append(jnp.cos(freq * state))
    return jnp.concatenate(feats, axis=-1)


# ---------------------------------------------------------------------------
# Demo
# ---------------------------------------------------------------------------

if __name__ == "__main__":
    key = jax.random.PRNGKey(0)
    k1, k2 = jax.random.split(key)
    B = 16
    rel_pos = jax.random.normal(k1, (B, 3), dtype=jnp.float32)
    vel = jax.random.normal(k2, (B, 3), dtype=jnp.float32)

    params = {"nerf_positional": {"L": 4}}
    ok = True

    # 'none'
    enc = StateEncoderPallas("none", params, disable_velocity=False)
    out = jax.block_until_ready(enc(rel_pos, vel))
    ok &= out.shape == (B, enc.get_output_size())
    ok &= bool(jnp.allclose(out, _ref_none(rel_pos, vel), atol=1e-6))

    # 'unit_vector_norm_separate'
    enc = StateEncoderPallas("unit_vector_norm_separate", params, disable_velocity=False)
    out = jax.block_until_ready(enc(rel_pos, vel))
    ok &= out.shape == (B, enc.get_output_size())
    ok &= bool(jnp.allclose(out, _ref_unit_norm(rel_pos, vel), atol=1e-5))

    # 'nerf_positional' (anchored angle-doubling, <=3 doublings of drift)
    enc = StateEncoderPallas("nerf_positional", params, disable_velocity=False)
    out = jax.block_until_ready(enc(rel_pos, vel))
    ok &= out.shape == (B, enc.get_output_size())
    ok &= bool(jnp.allclose(out, _ref_nerf(rel_pos, vel, params["nerf_positional"]["L"]),
                            atol=2e-5))

    # disable_velocity variant
    enc = StateEncoderPallas("unit_vector_norm_separate", params, disable_velocity=True)
    out = jax.block_until_ready(enc(rel_pos, vel))
    ok &= out.shape == (B, enc.get_output_size())
    ok &= bool(jnp.allclose(out, _ref_unit_norm(rel_pos, vel, disable_velocity=True),
                            atol=1e-5))

    # odd batch size (exercises padding + slice-back path)
    B2 = 5
    rp2 = jax.random.normal(k1, (B2, 3), dtype=jnp.float32)
    vl2 = jax.random.normal(k2, (B2, 3), dtype=jnp.float32)
    enc = StateEncoderPallas("nerf_positional", params, disable_velocity=False)
    out = jax.block_until_ready(enc(rp2, vl2))
    ok &= out.shape == (B2, enc.get_output_size())
    ok &= bool(jnp.allclose(out, _ref_nerf(rp2, vl2, params["nerf_positional"]["L"]),
                            atol=2e-5))

    if ok:
        print("KERNEL_OK")
    else:
        print("MISMATCH")
</pallas_src>

<mosaic_0001>
module attributes {stable_mosaic.version = 11 : i64} {
  func.func @_copy_kernel(%arg0: i32, %arg1: memref<3x128xf32, #tpu.memory_space<vmem>>, %arg2: memref<3x128xf32, #tpu.memory_space<vmem>>, %arg3: memref<6x128xf32, #tpu.memory_space<vmem>>) attributes {dimension_semantics = [#tpu.dimension_semantics<parallel>], iteration_bounds = array<i64: 1>, scalar_prefetch = 0 : i64, scratch_operands = 0 : i64, tpu.core_type = #tpu.core_type<tc>, window_params = [{transform_indices = @transform_0, window_bounds = array<i64: 3, 128>}, {transform_indices = @transform_1, window_bounds = array<i64: 3, 128>}, {transform_indices = @transform_2, window_bounds = array<i64: 6, 128>}]} {
    %c0 = arith.constant 0 : index
    %c0_0 = arith.constant 0 : index
    %0 = vector.load %arg1[%c0, %c0_0] : memref<3x128xf32, #tpu.memory_space<vmem>>, vector<3x128xf32>
    %c0_1 = arith.constant 0 : index
    %c0_2 = arith.constant 0 : index
    %1 = vector.load %arg3[%c0_1, %c0_2] : memref<6x128xf32, #tpu.memory_space<vmem>>, vector<3x128xf32>
    tpu.vector_store %arg3[%c0_1, %c0_2], %0 {strides = array<i32>} : memref<6x128xf32, #tpu.memory_space<vmem>>, vector<3x128xf32>,
    %c0_3 = arith.constant 0 : index
    %c0_4 = arith.constant 0 : index
    %2 = vector.load %arg2[%c0_3, %c0_4] : memref<3x128xf32, #tpu.memory_space<vmem>>, vector<3x128xf32>
    %c3 = arith.constant 3 : index
    %c0_5 = arith.constant 0 : index
    %3 = vector.load %arg3[%c3, %c0_5] : memref<6x128xf32, #tpu.memory_space<vmem>>, vector<3x128xf32>
    tpu.vector_store %arg3[%c3, %c0_5], %2 {strides = array<i32>} : memref<6x128xf32, #tpu.memory_space<vmem>>, vector<3x128xf32>,
    return
  }
  func.func @transform_0(%arg0: i32) -> (i32, i32) {
    %c0_i32 = arith.constant 0 : i32
    %c0_i32_0 = arith.constant 0 : i32
    return %c0_i32, %arg0 : i32, i32
  }
  func.func @transform_1(%arg0: i32) -> (i32, i32) {
    %c0_i32 = arith.constant 0 : i32
    %c0_i32_0 = arith.constant 0 : i32
    return %c0_i32, %arg0 : i32, i32
  }
  func.func @transform_2(%arg0: i32) -> (i32, i32) {
    %c0_i32 = arith.constant 0 : i32
    %c0_i32_0 = arith.constant 0 : i32
    return %c0_i32, %arg0 : i32, i32
  }
}

</mosaic_0001>

<bundles_post_ra>
// kernel: tpu_custom_call.1
= control target key start
LH: loop header
LB: loop body
LE: loop exit
PB: predicated region body
PF: predicated region fallthrough
CT: control target
= control target key end

     0   :  { %7 = vsyncpa [#allocation3], 0  ;;  %s152_s0 = inlined_call_operand.hbm [shape: f32[3,128], index: 0, kind: input, shape index: {}]   ;;  %s153_s1 = inlined_call_operand.hbm [shape: f32[3,128], index: 1, kind: input, shape index: {}]   ;;  %s154_s2 = inlined_call_operand.hbm [shape: f32[6,128], index: 2, kind: output, shape index: {}]  }
   0x1   :  { %8 = vsyncpa [#allocation6], 0 }
   0x2   :  { %9 = vsyncpa [#allocation4], 0  ;;  %s125_s9 = smov [#allocation2]   ;;  %s126_s11 = smov [#allocation5]  }
   0x3   :  { %s16_s10 = sshll.u32 %s125_s9, 4  ;;  %s26_s12 = sshll.u32 %s126_s11, 4  ;;  %s17_s10 = int_to_ptr.vmem [resolvable:$true] %s16_s10  ;;  %s27_s12 = int_to_ptr.vmem [resolvable:$true] %s26_s12 }
   0x4   :  { %s67_s13 = scalar_lea.vmem %s17_s10, 64  ;;  %p72_p1 = scmp.lt.s32.totalorder %s17_s10, %s17_s10 }
   0x5   :  { %p68_p0 = scmp.ne.s32.totalorder %s17_s10, %s67_s13  ;;  %p73_p2 = scmp.lt.s32.totalorder %s67_s13, %s67_s13 }
   0x7   :  { %p74_p3 = por %p73_p2, %p72_p1 }
   0x9   :  { %p75_p4 = pnand %p74_p3, %p68_p0 }
   0xb   :  { %78 = shalt.err (!%p75_p4)
}
   0xc   :  { %19 = dma.hbm_to_vmem [thread:$0]  %s152_s0, 64, %s17_s10, [#allocation3]  }
   0xd   :  { %s87_s16 = scalar_lea.vmem %s27_s12, 64  ;;  %p92_p6 = scmp.lt.s32.totalorder %s27_s12, %s27_s12 }
   0xe   :  { %p88_p5 = scmp.ne.s32.totalorder %s27_s12, %s87_s16  ;;  %p93_p7 = scmp.lt.s32.totalorder %s87_s16, %s87_s16 }
  0x10   :  { %p94_p8 = por %p93_p7, %p92_p6 }
  0x12   :  { %p95_p9 = pnand %p94_p8, %p88_p5 }
  0x14   :  { %98 = shalt.err (!%p95_p9)
}
  0x15   :  { %29 = dma.hbm_to_vmem [thread:$0]  %s153_s1, 64, %s27_s12, [#allocation6]  }
  0x16   :  { %119 = dma.done.wait [#allocation3], 64  }
  0x17   :  { %120 = vsyncadd [#allocation3], 4294967232 }
  0x18   :  { %121 = dma.done.wait [#allocation6], 64  }
  0x19   :  { %122 = vsyncadd [#allocation6], 4294967232  ;;  %s127_s19 = smov [#allocation7]   ;;  %v36_v0 = vld [vmem:[#allocation2] sm:$0x7] }
  0x1a   :  { %s46_s20 = sshll.u32 %s127_s19, 4  ;;  %v38_v1 = vld [vmem:[#allocation5] sm:$0x7]  ;;  %37 = vst [vmem:[#allocation7] sm:$0x7] %v36_v0  ;;  %s47_s20 = int_to_ptr.vmem [resolvable:$true] %s46_s20 }
  0x1b   :  { %39 = vst [vmem:[#allocation7 + $0x3] sm:$0x7] %v38_v1  ;;  %s99_s0 = scalar_lea.vmem %s47_s20, 128  ;;  %p104_p11 = scmp.lt.s32.totalorder %s47_s20, %s47_s20 }
  0x1c   :  { %p100_p10 = scmp.ne.s32.totalorder %s47_s20, %s99_s0  ;;  %p105_p12 = scmp.lt.s32.totalorder %s99_s0, %s99_s0 }
  0x1e   :  { %p106_p13 = por %p105_p12, %p104_p11 }
  0x20   :  { %p107_p0 = pnand %p106_p13, %p100_p10 }
  0x22   :  { %110 = shalt.err (!%p107_p0)
}
  0x23   :  { %49 = dma.vmem_to_hbm [thread:$0]  %s47_s20, 128, %s154_s2, [#allocation4]  }
  0x24   :  { %123 = dma.done.wait [#allocation4], 128  }
  0x25   :  { %124 = vsyncadd [#allocation4], 4294967168 }
  0x26   :  { %53 = vsyncpa [#allocation3], 1 }
  0x27   :  { %54 = vsyncpa [#allocation6], 1 }
  0x28   :  { %55 = vsyncpa [#allocation4], 1 }

</bundles_post_ra>
